<compile_context>
chip_gen: v7x
topology: tpu7x:2x2x1
jax: 0.10.0
libtpu: 0.0.40
codegen_flags: <defaults>
</compile_context>

<pallas_src>
import jax
import jax.numpy as jnp
from jax.experimental import pallas as pl
from jax.experimental.pallas import tpu as pltpu


def _round_up(n: int, m: int) -> int:
    return ((n + m - 1) // m) * m


def _tpu_defaults():
    """Per-generation row/column tile and scoped-VMEM cap defaults."""
    kind = ""
    try:
        kind = jax.devices()[0].device_kind.lower()
    except Exception:
        pass
    if ("v5 lite" in kind) or ("v5e" in kind) or ("v5lite" in kind):
        return dict(tm=256, tn=512, vmem_cap=64 << 20)
    if "v6" in kind:
        return dict(tm=768, tn=512, vmem_cap=100 << 20)
    if ("7x" in kind) or ("v7" in kind):
        return dict(tm=512, tn=256, vmem_cap=56 << 20)
    # v5p / v4 / unknown: conservative settings that fit everywhere.
    return dict(tm=256, tn=512, vmem_cap=64 << 20)


def _output_residual_gate_kernel(x_ref, y_ref, w_ref, zb_ref, o_ref):
    # x_ref : (tm, D_pad) full-width rows, resident across the column axis j
    # y_ref : (tm, tn)    streamed column slice
    # w_ref : (tn, D_pad) rows [j*tn, j*tn+tn) of the (out, in) Linear weight, bf16
    # zb_ref: (1, D_pad)  resident (DMA'd once)
    # o_ref : (tm, tn)
    tn = o_ref.shape[-1]
    j = pl.program_id(1)
    col0 = pl.multiple_of(j * tn, 128)  # lane-aligned column offset of this block

    # MXU: bf16 operands, f32 accumulation.  Contract the in-features axis of
    # both operands, i.e. x @ W.T without materializing W.T anywhere.
    z = jax.lax.dot_general(
        x_ref[...].astype(jnp.bfloat16),
        w_ref[...],
        dimension_numbers=(((1,), (1,)), ((), ())),
        preferred_element_type=jnp.float32,
    )                                                              # (tm, tn) f32
    z = jax.nn.sigmoid(z - zb_ref[:, pl.ds(col0, tn)])             # EUP
    y_relu = jnp.maximum(y_ref[...].astype(jnp.float32), 0.0)      # VPU
    x_res = x_ref[:, pl.ds(col0, tn)].astype(jnp.float32)          # in-VMEM slice
    o_ref[...] = (x_res + z * y_relu).astype(o_ref.dtype)


def prepare_output_residual_gate_params(W, zb):
    """Hoisted parameter prep: pad to a lane-aligned feature dim and cast W to bf16.

    Call once (at parameter load / init time), not per forward call.
    Returns (w_bf16 of shape (D_pad, D_pad), zb_row of shape (1, D_pad) f32).
    """
    D = W.shape[0]
    assert W.shape == (D, D) and zb.shape == (D,)
    D_pad = _round_up(D, 128)
    Wp = W if D_pad == D else jnp.pad(W, ((0, D_pad - D), (0, D_pad - D)))
    zbp = zb if D_pad == D else jnp.pad(zb, (0, D_pad - D))
    return Wp.astype(jnp.bfloat16), zbp.reshape(1, D_pad).astype(jnp.float32)


def output_residual_gate(x, y, w_bf16, zb_row, *, tm=None, tn=None, vmem_cap=None):
    """x, y: (..., d_model); w_bf16/zb_row: outputs of prepare_output_residual_gate_params."""
    orig_shape = x.shape
    D = orig_shape[-1]
    D_pad = w_bf16.shape[-1]
    assert w_bf16.shape == (D_pad, D_pad) and zb_row.shape == (1, D_pad)
    assert D_pad % 128 == 0 and D_pad >= D

    x2 = x.reshape(-1, D)
    y2 = y.reshape(-1, D)
    M = x2.shape[0]

    defaults = _tpu_defaults()
    if tm is None:
        tm = defaults["tm"]
    if tn is None:
        tn = defaults["tn"]
    if vmem_cap is None:
        vmem_cap = defaults["vmem_cap"]

    # Lane-aligned output-column tile that divides D_pad (tn=128 always divides).
    tn = max(128, min(_round_up(tn, 128), D_pad))
    while D_pad % tn:
        tn -= 128

    in_sz = x2.dtype.itemsize
    out_sz = x2.dtype.itemsize

    def _vmem_estimate(tm_):
        # Double-buffered streams + resident full-width rows (+ resident zb).
        return (2 * tm_ * D_pad * in_sz     # x full rows (resident over j)
                + 2 * tm_ * tn * in_sz      # y column slice
                + 2 * tn * D_pad * 2        # W slab (bf16)
                + 2 * tm_ * tn * out_sz     # out column slice
                + 2 * D_pad * 4)            # zb

    # Shrink the row tile until the tiling fits the generation's VMEM cap.
    while tm > 64 and _vmem_estimate(tm) + (8 << 20) > vmem_cap:
        tm = max(64, _round_up(tm // 2, 8))

    # Never use a row tile larger than the (8-aligned) row count.
    tm = max(8, min(_round_up(tm, 8), _round_up(M, 8)))

    # Zero-pad ONLY the feature / contraction dim (required so padded K columns
    # contribute nothing to the matmul).  Ragged rows are handled by the cdiv
    # grid + clipped last block: garbage OOB rows only affect OOB outputs,
    # whose stores are discarded.
    if D_pad != D:
        x2 = jnp.pad(x2, ((0, 0), (0, D_pad - D)))
        y2 = jnp.pad(y2, ((0, 0), (0, D_pad - D)))

    grid = (pl.cdiv(M, tm), D_pad // tn)
    vmem_limit = int(min(max(_vmem_estimate(tm) + (16 << 20), 32 << 20), vmem_cap))

    out = pl.pallas_call(
        _output_residual_gate_kernel,
        out_shape=jax.ShapeDtypeStruct((M, D_pad), x.dtype),
        grid_spec=pltpu.PrefetchScalarGridSpec(
            num_scalar_prefetch=0,
            grid=grid,
            in_specs=[
                pl.BlockSpec((tm, D_pad), lambda i, j: (i, 0)),   # x rows (resident over j)
                pl.BlockSpec((tm, tn), lambda i, j: (i, j)),      # y column slice
                pl.BlockSpec((tn, D_pad), lambda i, j: (j, 0)),   # W slab for output cols j
                pl.BlockSpec((1, D_pad), lambda i, j: (0, 0)),    # zb, resident
            ],
            out_specs=pl.BlockSpec((tm, tn), lambda i, j: (i, j)),
        ),
        compiler_params=pltpu.CompilerParams(
            dimension_semantics=("parallel", "parallel"),
            vmem_limit_bytes=vmem_limit,
        ),
    )(x2, y2, w_bf16, zb_row)

    if D_pad != D:
        out = out[:, :D]
    return out.reshape(orig_shape)


def output_residual_gate_raw(x, y, W, zb, **kwargs):
    """Convenience path taking the raw f32 PyTorch-layout parameters."""
    w_bf16, zb_row = prepare_output_residual_gate_params(W, zb)
    return output_residual_gate(x, y, w_bf16, zb_row, **kwargs)


if __name__ == "__main__":
    batch, seq, d_model = 2, 8, 32

    key = jax.random.PRNGKey(0)
    kx, ky, kw = jax.random.split(key, 3)

    x = jax.random.normal(kx, (batch, seq, d_model), dtype=jnp.float32)
    y = jax.random.normal(ky, (batch, seq, d_model), dtype=jnp.float32)

    # Deterministic parameter init (synthetic):
    #   zb = full((d_model,), -1.0)  -- as in the PyTorch __init__
    #   W  ~ uniform(-1/sqrt(d_model), 1/sqrt(d_model))  (Linear default style)
    zb = jnp.full((d_model,), -1.0, dtype=jnp.float32)
    bound = 1.0 / jnp.sqrt(jnp.float32(d_model))
    W = jax.random.uniform(kw, (d_model, d_model), dtype=jnp.float32,
                           minval=-bound, maxval=bound)

    # Parameter prep (pad + bf16 cast) hoisted out of the per-call hot path.
    w_bf16, zb_row = prepare_output_residual_gate_params(W, zb)

    out = output_residual_gate(x, y, w_bf16, zb_row)
    out = jax.block_until_ready(out)

    # Pure-JAX f32 reference of the exact forward semantics (kernel matmul uses
    # bf16 operands with f32 accumulation, hence the looser tolerance).
    z_ref = jax.nn.sigmoid(jnp.einsum("btd,ed->bte", x, W) - zb)
    ref = x + z_ref * jnp.maximum(y, 0.0)
    assert jnp.allclose(out, ref, atol=2e-2, rtol=2e-2), "mismatch vs reference"

    # Ragged row-count path (M not a multiple of the row tile): exercises the
    # clipped-last-block grid handling that replaced the full-tensor M padding.
    xr = jax.random.normal(kx, (3, 5, d_model), dtype=jnp.float32)
    yr = jax.random.normal(ky, (3, 5, d_model), dtype=jnp.float32)
    out_r = jax.block_until_ready(output_residual_gate(xr, yr, w_bf16, zb_row, tm=8))
    z_r = jax.nn.sigmoid(jnp.einsum("btd,ed->bte", xr, W) - zb)
    ref_r = xr + z_r * jnp.maximum(yr, 0.0)
    assert jnp.allclose(out_r, ref_r, atol=2e-2, rtol=2e-2), "ragged-row mismatch"

    print("KERNEL_OK")
</pallas_src>

<mosaic_0001>
module attributes {stable_mosaic.version = 11 : i64} {
  func.func @_output_residual_gate_kernel(%arg0: i32, %arg1: i32, %arg2: memref<16x128xf32, #tpu.memory_space<vmem>>, %arg3: memref<16x128xf32, #tpu.memory_space<vmem>>, %arg4: memref<128x128xbf16, #tpu.memory_space<vmem>>, %arg5: memref<1x128xf32, #tpu.memory_space<vmem>>, %arg6: memref<16x128xf32, #tpu.memory_space<vmem>>) attributes {dimension_semantics = [#tpu.dimension_semantics<parallel>, #tpu.dimension_semantics<parallel>], iteration_bounds = array<i64: 1, 1>, scalar_prefetch = 0 : i64, scratch_operands = 0 : i64, tpu.core_type = #tpu.core_type<tc>, window_params = [{transform_indices = @transform_0, window_bounds = array<i64: 16, 128>}, {transform_indices = @transform_1, window_bounds = array<i64: 16, 128>}, {transform_indices = @transform_2, window_bounds = array<i64: 128, 128>}, {pipeline_mode = #tpu.pipeline_mode<synchronous>, transform_indices = @transform_3, window_bounds = array<i64: 1, 128>}, {transform_indices = @transform_4, window_bounds = array<i64: 16, 128>}]} {
    %c128_i32 = arith.constant 128 : i32
    %0 = arith.muli %arg1, %c128_i32 : i32
    %1 = tpu.assume_multiple %0, 128 : i32
    %c0 = arith.constant 0 : index
    %c0_0 = arith.constant 0 : index
    %2 = vector.load %arg2[%c0, %c0_0] : memref<16x128xf32, #tpu.memory_space<vmem>>, vector<16x128xf32>
    %3 = arith.truncf %2 : vector<16x128xf32> to vector<16x128xbf16>
    %c0_1 = arith.constant 0 : index
    %c0_2 = arith.constant 0 : index
    %4 = vector.load %arg4[%c0_1, %c0_2] : memref<128x128xbf16, #tpu.memory_space<vmem>>, vector<128x128xbf16>
    %cst = arith.constant dense<0.000000e+00> : vector<16x128xf32>
    %5 = tpu.matmul %3, %4, %cst {dimension_numbers = #tpu.dot_dimension_numbers<[1], [1], [0], [0], [0, 0, 1, 0], [], []>} : vector<16x128xbf16>, vector<128x128xbf16>, vector<16x128xf32> -> vector<16x128xf32>
    %c0_3 = arith.constant 0 : index
    %6 = arith.index_cast %1 : i32 to index
    %7 = vector.load %arg5[%c0_3, %6] : memref<1x128xf32, #tpu.memory_space<vmem>>, vector<1x128xf32>
    %8 = vector.broadcast %7 : vector<1x128xf32> to vector<16x128xf32>
    %9 = arith.subf %5, %8 : vector<16x128xf32>
    %10 = arith.negf %9 : vector<16x128xf32>
    %11 = math.exp %10 : vector<16x128xf32>
    %cst_4 = arith.constant 1.000000e+00 : f32
    %12 = vector.broadcast %cst_4 : f32 to vector<16x128xf32>
    %13 = arith.addf %12, %11 : vector<16x128xf32>
    %14 = arith.divf %12, %13 : vector<16x128xf32>
    %c0_5 = arith.constant 0 : index
    %c0_6 = arith.constant 0 : index
    %15 = vector.load %arg3[%c0_5, %c0_6] : memref<16x128xf32, #tpu.memory_space<vmem>>, vector<16x128xf32>
    %cst_7 = arith.constant 0.000000e+00 : f32
    %16 = vector.broadcast %cst_7 : f32 to vector<16x128xf32>
    %17 = arith.maximumf %15, %16 : vector<16x128xf32>
    %c0_8 = arith.constant 0 : index
    %18 = arith.index_cast %1 : i32 to index
    %19 = vector.load %arg2[%c0_8, %18] : memref<16x128xf32, #tpu.memory_space<vmem>>, vector<16x128xf32>
    %20 = arith.mulf %14, %17 : vector<16x128xf32>
    %21 = arith.addf %19, %20 : vector<16x128xf32>
    %c0_9 = arith.constant 0 : index
    %c0_10 = arith.constant 0 : index
    %22 = vector.load %arg6[%c0_9, %c0_10] : memref<16x128xf32, #tpu.memory_space<vmem>>, vector<16x128xf32>
    tpu.vector_store %arg6[%c0_9, %c0_10], %21 {strides = array<i32>} : memref<16x128xf32, #tpu.memory_space<vmem>>, vector<16x128xf32>,
    return
  }
  func.func @transform_0(%arg0: i32, %arg1: i32) -> (i32, i32) {
    %c0_i32 = arith.constant 0 : i32
    %c0_i32_0 = arith.constant 0 : i32
    return %arg0, %c0_i32 : i32, i32
  }
  func.func @transform_1(%arg0: i32, %arg1: i32) -> (i32, i32) {
    %c0_i32 = arith.constant 0 : i32
    return %arg0, %arg1 : i32, i32
  }
  func.func @transform_2(%arg0: i32, %arg1: i32) -> (i32, i32) {
    %c0_i32 = arith.constant 0 : i32
    %c0_i32_0 = arith.constant 0 : i32
    return %arg1, %c0_i32 : i32, i32
  }
  func.func @transform_3(%arg0: i32, %arg1: i32) -> (i32, i32) {
    %c0_i32 = arith.constant 0 : i32
    %c0_i32_0 = arith.constant 0 : i32
    %c0_i32_1 = arith.constant 0 : i32
    return %c0_i32, %c0_i32_0 : i32, i32
  }
  func.func @transform_4(%arg0: i32, %arg1: i32) -> (i32, i32) {
    %c0_i32 = arith.constant 0 : i32
    return %arg0, %arg1 : i32, i32
  }
}

</mosaic_0001>

<bundles_post_ra>
// kernel: tpu_custom_call.1
= control target key start
LH: loop header
LB: loop body
LE: loop exit
PB: predicated region body
PF: predicated region fallthrough
CT: control target
= control target key end

     0   :  { %9 = vsyncpa [#allocation3], 0  ;;  %s488_s0 = inlined_call_operand.hbm [shape: f32[16,128], index: 0, kind: input, shape index: {}]   ;;  %s489_s1 = inlined_call_operand.hbm [shape: f32[16,128], index: 1, kind: input, shape index: {}]   ;;  %s490_s2 = inlined_call_operand.hbm [shape: bf16[128,128], index: 2, kind: input, shape index: {}]   ;;  %s491_s3 = inlined_call_operand.vmem [shape: f32[1,128], index: 3, kind: input, shape index: {}]   ;;  %s492_s4 = inlined_call_operand.hbm [shape: f32[16,128], index: 4, kind: output, shape index: {}]  }
   0x1   :  { %10 = vsyncpa [#allocation6], 0 }
   0x2   :  { %11 = vsyncpa [#allocation4], 0  ;;  %s386_s15 = smov [#allocation5]   ;;  %s387_s17 = smov [#allocation2]  }
   0x3   :  { %s29_s16 = sshll.u32 %s386_s15, 4  ;;  %s17_s18 = sshll.u32 %s387_s17, 4  ;;  %s30_s16 = int_to_ptr.vmem [resolvable:$true] %s29_s16  ;;  %s421_s18 = int_to_ptr.vmem [resolvable:$true] %s17_s18 }
   0x4   :  { %s292_s21 = scalar_lea.hbm %s489_s1, 256 }
   0x5   :  { %p293_p0 = scmp.ne.s32.totalorder %s489_s1, %s292_s21  ;;  %p296_p1 = scmp.lt.u32.totalorder %s292_s21, %s489_s1 }
   0x7   :  { %p298_p2 = pnand %p296_p1, %p293_p0 }
   0x9   :  { %301 = shalt.err (!%p298_p2)
}
   0xa   :  { %s302_s26 = scalar_lea.vmem %s30_s16, 256  ;;  %p307_p4 = scmp.lt.s32.totalorder %s30_s16, %s30_s16 }
   0xb   :  { %p303_p3 = scmp.ne.s32.totalorder %s30_s16, %s302_s26  ;;  %p308_p5 = scmp.lt.s32.totalorder %s302_s26, %s302_s26 }
   0xd   :  { %p309_p6 = por %p308_p5, %p307_p4 }
   0xf   :  { %p310_p7 = pnand %p309_p6, %p303_p3 }
  0x11   :  { %313 = shalt.err (!%p310_p7)
}
  0x12   :  { %s388_s27 = smov 128   ;;  %s389_s28 = smov 8  }
  0x13   :  { %35 = dma.hbm_to_vmem [thread:$0]  %s489_s1, 256, %s30_s16, [#allocation6], %s388_s27, %s388_s27, %s389_s28  }
  0x14   :  { %s314_s7 = scalar_lea.hbm %s488_s0, 256 }
  0x15   :  { %p315_p8 = scmp.ne.s32.totalorder %s488_s0, %s314_s7  ;;  %p318_p9 = scmp.lt.u32.totalorder %s314_s7, %s488_s0 }
  0x17   :  { %p320_p10 = pnand %p318_p9, %p315_p8 }
  0x19   :  { %323 = shalt.err (!%p320_p10)
}
  0x1a   :  { %s324_s12 = scalar_lea.vmem %s421_s18, 256  ;;  %p329_p12 = scmp.lt.s32.totalorder %s421_s18, %s421_s18 }
  0x1b   :  { %p325_p11 = scmp.ne.s32.totalorder %s421_s18, %s324_s12  ;;  %p330_p13 = scmp.lt.s32.totalorder %s324_s12, %s324_s12 }
  0x1d   :  { %p331_p0 = por %p330_p13, %p329_p12 }
  0x1f   :  { %p332_p1 = pnand %p331_p0, %p325_p11 }
  0x21   :  { %335 = shalt.err (!%p332_p1)
}
  0x22   :  { %23 = dma.hbm_to_vmem [thread:$0]  %s488_s0, 256, %s421_s18, [#allocation3], %s388_s27, %s388_s27, %s389_s28  }
  0x23   :  { %s390_s14 = smov [#allocation7]   ;;  %s336_s19 = scalar_lea.hbm %s490_s2, 1024 }
  0x24   :  { %s41_s15 = sshll.u32 %s390_s14, 4  ;;  %p337_p2 = scmp.ne.s32.totalorder %s490_s2, %s336_s19  ;;  %s42_s15 = int_to_ptr.vmem [resolvable:$true] %s41_s15 }
  0x25   :  { %p340_p3 = scmp.lt.u32.totalorder %s336_s19, %s490_s2 }
  0x27   :  { %p342_p4 = pnand %p340_p3, %p337_p2 }
  0x29   :  { %345 = shalt.err (!%p342_p4)
}
  0x2a   :  { %s346_s24 = scalar_lea.vmem %s42_s15, 1024  ;;  %p351_p6 = scmp.lt.s32.totalorder %s42_s15, %s42_s15 }
  0x2b   :  { %p347_p5 = scmp.ne.s32.totalorder %s42_s15, %s346_s24  ;;  %p352_p7 = scmp.lt.s32.totalorder %s346_s24, %s346_s24 }
  0x2d   :  { %p353_p8 = por %p352_p7, %p351_p6 }
  0x2f   :  { %p354_p9 = pnand %p353_p8, %p347_p5 }
  0x31   :  { %357 = shalt.err (!%p354_p9)
}
  0x32   :  { %s391_s0 = smov 64   ;;  %s392_s18 = smov 4  }
  0x33   :  { %47 = dma.hbm_to_vmem [thread:$0]  %s490_s2, 1024, %s42_s15, [#allocation6], %s391_s0, %s391_s0, %s392_s18  }
  0x34   :  { %380 = dma.done.wait [#allocation3], 256  }
  0x35   :  { %381 = vsyncadd [#allocation3], 4294967040 }
  0x36   :  { %382 = dma.done.wait [#allocation6], 1280  }
  0x37   :  { %383 = vsyncadd [#allocation6], 4294966016  ;;  %v393_v0 = vmov 0.0   ;;  %vm394_vm0 = vmmov 0   ;;  %v276_v1 = vld [vmem:[#allocation7] sm:$0xff]   ;;  %v277_v2 = vld [vmem:[#allocation7 + $0x8] sm:$0xff]  }
  0x38   :  { %246 = vmatprep.subr.bf16.mxu0 %v393_v0  ;;  %262 = vmatprep.mubr.msk.bf16.mxu0 %vm394_vm0, %v393_v0  ;;  %v278_v3 = vld [vmem:[#allocation7 + $0x10] sm:$0xff]   ;;  %v279_v4 = vld [vmem:[#allocation7 + $0x18] sm:$0xff]   ;;  %v280_v5 = vld [vmem:[#allocation7 + $0x20] sm:$0xff]  }
  0x39   :  { %247 = vmatpush3.bf16.xpose.msra.mxu0 %v276_v1  ;;  %v281_v6 = vld [vmem:[#allocation7 + $0x28] sm:$0xff]   ;;  %v282_v7 = vld [vmem:[#allocation7 + $0x30] sm:$0xff]   ;;  %v283_v8 = vld [vmem:[#allocation7 + $0x38] sm:$0xff]  }
  0x3a   :  { %248 = vmatprep.subr.bf16.mxu0 %v393_v0  ;;  %v61_v9 = vld [vmem:[#allocation2] sm:$0xff]  ;;  %v62_v10 = vld [vmem:[#allocation2 + $0x8] sm:$0xff]  ;;  %v193_v25 = vld [vmem:[#allocation5] sm:$0xff] }
  0x3b   :  { %v63_v11 = vpack.c.bf16 %v62_v10, %v61_v9  ;;  %v234_v12 = vld [vmem:[%s491_s3] ss:$0 sm:$0xff]  ;;  %v194_v26 = vld [vmem:[#allocation5 + $0x8] sm:$0xff]  ;;  %v195_v27 = vmax.f32 %v193_v25, 0.0  ;;  %s395_s3 = smov [#allocation8]  }
  0x3c   :  { %v196_v28 = vmax.f32 %v194_v26, 0.0  ;;  %s211_s30 = sshll.u32 %s395_s3, 4  ;;  %s212_s30 = int_to_ptr.vmem [resolvable:$true] %s211_s30 }
  0x3d   :  { %s358_s5 = scalar_lea.vmem %s212_s30, 256  ;;  %p363_p11 = scmp.lt.s32.totalorder %s212_s30, %s212_s30 }
  0x3e   :  { %p359_p10 = scmp.ne.s32.totalorder %s212_s30, %s358_s5  ;;  %p364_p12 = scmp.lt.s32.totalorder %s358_s5, %s358_s5 }
  0x40   :  { %p365_p13 = por %p364_p12, %p363_p11 }
  0x41   :  { %249 = vmatpush3.bf16.xpose.msra.mxu0 %v277_v2 }
  0x42   :  { %250 = vmatprep.subr.bf16.mxu0 %v393_v0  ;;  %p366_p0 = pnand %p365_p13, %p359_p10 }
  0x49   :  { %251 = vmatpush3.bf16.xpose.msra.mxu0 %v278_v3 }
  0x4a   :  { %252 = vmatprep.subr.bf16.mxu0 %v393_v0 }
  0x51   :  { %253 = vmatpush3.bf16.xpose.msra.mxu0 %v279_v4 }
  0x52   :  { %254 = vmatprep.subr.bf16.mxu0 %v393_v0 }
  0x59   :  { %255 = vmatpush3.bf16.xpose.msra.mxu0 %v280_v5 }
  0x5a   :  { %256 = vmatprep.subr.bf16.mxu0 %v393_v0 }
  0x61   :  { %257 = vmatpush3.bf16.xpose.msra.mxu0 %v281_v6 }
  0x62   :  { %258 = vmatprep.subr.bf16.mxu0 %v393_v0 }
  0x69   :  { %259 = vmatpush3.bf16.xpose.msra.mxu0 %v282_v7 }
  0x6a   :  { %260 = vmatprep.subr.bf16.mxu0 %v393_v0 }
  0x71   :  { %261 = vmatpush3.bf16.xpose.msra.mxu0 %v283_v8 }
  0x78   :  { %263 = vmatmul.mubr.bf16.vlgmr.msra.gmra.mrb[0].mxu0 %v63_v11 }
 0x14b   :  { %v162_v13 = vpop.f32.mrb[0].mxu0 }
 0x14c   :  { %v179_v14 = vsub.f32 %v162_v13, %v234_v12  ;;  %v264_v15 = vpop.f32.mrb[1].mxu0 }
 0x14d   :  { %v165_v16 = vpop.f32.mrb[2].mxu0 }
 0x14e   :  { %v235_v17 = vmul.f32 -1.442695, %v179_v14  ;;  %v180_v18 = vsub.f32 %v165_v16, %v234_v12  ;;  %v265_v19 = vpop.f32.mrb[3].mxu0 }
 0x150   :  { %284 = vpow2.f32 %v235_v17  ;;  %v236_v20 = vmul.f32 -1.442695, %v180_v18 }
 0x152   :  { %286 = vpow2.f32 %v236_v20 }
 0x15a   :  { %v285_v21 = vpop.eup %284 }
 0x15b   :  { %v187_v22 = vadd.f32 1.0, %v285_v21 }
 0x15c   :  { %v287_v23 = vpop.eup %286 }
 0x15d   :  { %288 = vrcp.f32 %v187_v22  ;;  %v188_v24 = vadd.f32 1.0, %v287_v23 }
 0x15f   :  { %290 = vrcp.f32 %v188_v24 }
 0x167   :  { %v289_v29 = vpop.eup %288 }
 0x168   :  { %v200_v30 = vmul.f32 %v289_v29, %v195_v27 }
 0x169   :  { %v291_v31 = vpop.eup %290 }
 0x16a   :  { %v201_v32 = vmul.f32 %v291_v31, %v196_v28  ;;  %v202_v33 = vadd.f32 %v200_v30, %v61_v9 }
 0x16c   :  { %v203_v34 = vadd.f32 %v201_v32, %v62_v10  ;;  %204 = vst [vmem:[#allocation8] sm:$0xff] %v202_v33 }
 0x16e   :  { %205 = vst [vmem:[#allocation8 + $0x8] sm:$0xff] %v203_v34 }
 0x16f   :  { %369 = shalt.err (!%p366_p0)
}
 0x170   :  { %s370_s8 = scalar_lea.hbm %s492_s4, 256 }
 0x171   :  { %p371_p1 = scmp.ne.s32.totalorder %s492_s4, %s370_s8  ;;  %p374_p2 = scmp.lt.u32.totalorder %s370_s8, %s492_s4 }
 0x173   :  { %p376_p3 = pnand %p374_p2, %p371_p1 }
 0x175   :  { %379 = shalt.err (!%p376_p3)
}
 0x176   :  { %217 = dma.vmem_to_hbm [thread:$0]  %s212_s30, 256, %s492_s4, [#allocation4], %s388_s27, %s388_s27, %s389_s28  }
 0x177   :  { %384 = dma.done.wait [#allocation4], 256  }
 0x178   :  { %385 = vsyncadd [#allocation4], 4294967040 }
 0x179   :  { %221 = vsyncpa [#allocation3], 1 }
 0x17a   :  { %222 = vsyncpa [#allocation6], 1 }
 0x17b   :  { %223 = vsyncpa [#allocation4], 1 }

</bundles_post_ra>
